<compile_context>
chip_gen: v7x
topology: tpu7x:2x2x1
jax: 0.10.0
libtpu: 0.0.40
codegen_flags: <defaults>
</compile_context>

<pallas_src>
import functools

import jax
import jax.numpy as jnp
from jax import lax
from jax.experimental import pallas as pl
from jax.experimental.pallas import tpu as pltpu


_STATIC_GROUPS_MAX = 8   # fully unroll the group loop up to this many 128-lane groups
_GROUP_UNROLL = 8        # unroll factor inside the fori_loop for larger blocks


def _dice_sums_kernel(pred_ref, targ_ref, inter_ref, go_ref, po_ref, *,
                      squared_pred, n_groups, block_cols, tiles_per_split,
                      valid_cols, needs_mask, t_rows):
    k = pl.program_id(2)  # HW (reduction) axis — innermost, "arbitrary"

    @pl.when(k == 0)
    def _init():
        inter_ref[...] = jnp.zeros_like(inter_ref)
        go_ref[...] = jnp.zeros_like(go_ref)
        po_ref[...] = jnp.zeros_like(po_ref)

    if needs_mask:
        # Global column offset of this block (accounts for the parallel HW split).
        base_col = (pl.program_id(0) * tiles_per_split + k) * block_cols
        lane_iota = lax.broadcasted_iota(jnp.int32, (t_rows, 128), 1)

    def group_step(g, carry):
        acc_i, acc_g, acc_p = carry
        if isinstance(g, int):                       # static ref slice: free
            p = pred_ref[:, g * 128:(g + 1) * 128]
            t = targ_ref[:, g * 128:(g + 1) * 128]
        else:                                        # dynamic slice inside fori_loop
            off = pl.multiple_of(g * 128, 128)
            p = pred_ref[:, pl.ds(off, 128)]
            t = targ_ref[:, pl.ds(off, 128)]
        p = p.astype(jnp.float32)
        t = t.astype(jnp.float32)
        if needs_mask:
            m = lane_iota < (valid_cols - base_col - g * 128)
            p = jnp.where(m, p, 0.0)
            t = jnp.where(m, t, 0.0)
        acc_i = acc_i + p * t
        acc_g = acc_g + ((t * t) if squared_pred else t)
        acc_p = acc_p + ((p * p) if squared_pred else p)
        return acc_i, acc_g, acc_p

    zero = jnp.zeros((t_rows, 128), jnp.float32)
    carry = (zero, zero, zero)

    if n_groups <= _STATIC_GROUPS_MAX:
        for g in range(n_groups):                    # fully static unroll
            carry = group_step(g, carry)
    else:
        n_outer = n_groups // _GROUP_UNROLL

        def outer_body(o, c):
            for u in range(_GROUP_UNROLL):
                c = group_step(o * _GROUP_UNROLL + u, c)
            return c

        carry = lax.fori_loop(0, n_outer, outer_body, carry)
        for g in range(n_outer * _GROUP_UNROLL, n_groups):   # static remainder
            carry = group_step(g, carry)

    acc_i, acc_g, acc_p = carry
    inter_ref[...] += acc_i
    go_ref[...] += acc_g
    po_ref[...] += acc_p


def _vmem_capacity_bytes():
    try:
        info = pltpu.get_tpu_info()
        cap = getattr(info, "vmem_capacity_bytes", None)
        if cap:
            return int(cap)
    except Exception:
        pass
    return 64 * 1024 * 1024  # conservative default (v7x-class)


def dice_loss(pred, target, *,
              include_background=True, squared_pred=False, jaccard=False,
              reduction="mean", smooth_nr=1e-5, smooth_dr=1e-5, weight=None,
              max_block_bytes=None):
    """pred/target: (B, N, H, W[, D]) probability tensors. Mirrors DiceLoss.forward."""
    if not include_background and pred.shape[1] > 1:
        # TODO(synk): skip class 0 via the row index_map (scalar-prefetched row table)
        # instead of this wrapper slice, which costs one extra HBM read+write pass.
        pred = pred[:, 1:]
        target = target[:, 1:]
    assert pred.shape == target.shape, "ground truth has different shape from input"

    B, N_eff = pred.shape[0], pred.shape[1]
    HW = 1
    for d in pred.shape[2:]:
        HW *= d
    BN = B * N_eff

    # Keep native dtype — no wrapper-side f32 copy, no jnp.pad copy.
    pred2d = pred.reshape(BN, HW)
    targ2d = target.reshape(BN, HW)
    itemsize = max(pred2d.dtype.itemsize, targ2d.dtype.itemsize)

    # Sublane fold (pure reshape): fold HW into the row axis so f32 vregs are full
    # and the row tile can reach 32 (keeps the per-block group count low).
    ROW_TARGET = 32
    s, rows, cols = 1, BN, HW
    while rows < ROW_TARGET and cols % 2 == 0 and cols // 2 >= 128:
        s *= 2
        rows *= 2
        cols //= 2
    if s > 1:
        pred2d = pred2d.reshape(rows, cols)
        targ2d = targ2d.reshape(rows, cols)

    # ---- generation-aware tile / VMEM budget ----
    vmem_cap = _vmem_capacity_bytes()
    if vmem_cap <= 64 * 1024 * 1024:           # v7x-class: 64 MiB VMEM per core
        per_block_budget = 4 * 1024 * 1024
        vmem_ceiling = 48 * 1024 * 1024
    else:                                       # v5e / v6e: 128 MiB VMEM
        per_block_budget = 8 * 1024 * 1024
        vmem_ceiling = 96 * 1024 * 1024
    if max_block_bytes is not None:             # testing / tuning override
        per_block_budget = int(max_block_bytes)

    # Row tile: multiple of 8 (accumulators stay vreg-resident at <= 32 rows),
    # or the full extent when rows is not a multiple of 8.
    if rows % 8 == 0:
        t_rows = 8
        for cand in (32, 24, 16, 8):
            if cand <= rows and rows % cand == 0:
                t_rows = cand
                break
    else:
        t_rows = rows

    # Column tile: multiple of 128, sized from the per-input-block VMEM budget.
    total_groups = (cols + 127) // 128
    cap_cols = max(128, (per_block_budget // (t_rows * itemsize)) // 128 * 128)
    block_cols = min(total_groups * 128, cap_cols)
    n_groups = block_cols // 128
    needs_mask = (cols % block_cols) != 0       # ragged lane tail handled in-kernel

    row_tiles = rows // t_rows
    hw_tiles = (cols + block_cols - 1) // block_cols

    # Leading parallel split of the HW range: gives v7x's two TensorCores work when
    # there is only one row tile; negligible cost on single-core chips.
    n_split = 2 if (row_tiles == 1 and hw_tiles >= 4 and hw_tiles % 2 == 0) else 1
    tiles_per_split = hw_tiles // n_split
    grid = (n_split, row_tiles, tiles_per_split)

    # Honest VMEM footprint: 2 inputs x 2 bufs + 3 resident outputs x 2 bufs + carries.
    foot = (2 * 2 * t_rows * block_cols * itemsize
            + 3 * 2 * t_rows * 128 * 4
            + 3 * t_rows * 128 * 4)
    vmem_limit = int(min(vmem_ceiling, max(32 * 1024 * 1024, 2 * foot + (2 << 20))))

    flops_per_elem = 6 if squared_pred else 4
    cost = pl.CostEstimate(
        flops=int(flops_per_elem * rows * cols),
        transcendentals=0,
        bytes_accessed=int(rows * cols * (pred2d.dtype.itemsize + targ2d.dtype.itemsize)
                           + 3 * n_split * rows * 128 * 4),
    )

    kernel = functools.partial(
        _dice_sums_kernel,
        squared_pred=squared_pred, n_groups=n_groups, block_cols=block_cols,
        tiles_per_split=tiles_per_split, valid_cols=cols,
        needs_mask=needs_mask, t_rows=t_rows)

    in_map = lambda p, i, k: (i, p * tiles_per_split + k)
    out_map = lambda p, i, k: (p, i, 0)

    inter_w, go_w, po_w = pl.pallas_call(
        kernel,
        out_shape=(
            jax.ShapeDtypeStruct((n_split, rows, 128), jnp.float32),
            jax.ShapeDtypeStruct((n_split, rows, 128), jnp.float32),
            jax.ShapeDtypeStruct((n_split, rows, 128), jnp.float32),
        ),
        grid_spec=pltpu.PrefetchScalarGridSpec(
            num_scalar_prefetch=0,
            grid=grid,
            in_specs=[
                pl.BlockSpec((t_rows, block_cols), in_map),
                pl.BlockSpec((t_rows, block_cols), in_map),
            ],
            out_specs=[
                pl.BlockSpec((None, t_rows, 128), out_map),
                pl.BlockSpec((None, t_rows, 128), out_map),
                pl.BlockSpec((None, t_rows, 128), out_map),
            ],
        ),
        compiler_params=pltpu.CompilerParams(
            dimension_semantics=("parallel", "parallel", "arbitrary"),
            vmem_limit_bytes=vmem_limit,
        ),
        cost_estimate=cost,
    )(pred2d, targ2d)

    # ---- tiny epilogue in plain JAX (per-(B,N) values only) ----
    intersection = inter_w.sum(axis=0).reshape(BN, s * 128).sum(axis=-1)
    ground_o = go_w.sum(axis=0).reshape(BN, s * 128).sum(axis=-1)
    pred_o = po_w.sum(axis=0).reshape(BN, s * 128).sum(axis=-1)

    denominator = ground_o + pred_o
    if jaccard:
        denominator = 2.0 * (denominator - intersection)
    f = 1.0 - (2.0 * intersection + float(smooth_nr)) / (denominator + float(smooth_dr))
    f = f.reshape(B, N_eff)

    if weight is not None and N_eff != 1:
        w = jnp.asarray(weight, dtype=f.dtype)
        if w.ndim == 0:
            w = jnp.full((N_eff,), w, dtype=f.dtype)
        f = f * w.reshape(1, N_eff)

    if reduction == "mean":
        return jnp.mean(f)
    if reduction == "sum":
        return jnp.sum(f)
    if reduction is None or reduction == "none":
        return f.reshape((B, N_eff) + (1,) * (pred.ndim - 2))
    raise ValueError(f'Unsupported reduction: {reduction}, available options are ["mean", "sum"].')


def _reference_dice_loss(pred, target, *, squared_pred=False, jaccard=False,
                         smooth_nr=1e-5, smooth_dr=1e-5):
    pred = pred.astype(jnp.float32)
    target = target.astype(jnp.float32)
    axes = tuple(range(2, pred.ndim))
    inter = jnp.sum(target * pred, axis=axes)
    if squared_pred:
        go = jnp.sum(target * target, axis=axes)
        po = jnp.sum(pred * pred, axis=axes)
    else:
        go = jnp.sum(target, axis=axes)
        po = jnp.sum(pred, axis=axes)
    denom = go + po
    if jaccard:
        denom = 2.0 * (denom - inter)
    f = 1.0 - (2.0 * inter + smooth_nr) / (denom + smooth_dr)
    return jnp.mean(f)


if __name__ == "__main__":
    key = jax.random.PRNGKey(0)
    k1, k2, k3, k4 = jax.random.split(key, 4)

    # Case 1: default config, f32 inputs.
    B, N, H, W = 2, 4, 16, 16
    pred = jax.nn.softmax(jax.random.normal(k1, (B, N, H, W), jnp.float32), axis=1)
    labels = jax.random.randint(k2, (B, 1, H, W), 0, N)
    target = (labels == jnp.arange(N).reshape(1, N, 1, 1)).astype(jnp.float32)

    loss = jax.block_until_ready(dice_loss(pred, target))
    ref = _reference_dice_loss(pred, target)
    assert jnp.allclose(loss, ref, atol=1e-5, rtol=1e-5), (loss, ref)

    # Case 2: bf16 inputs streamed at native width (no wrapper-side f32 copy).
    loss_bf = jax.block_until_ready(
        dice_loss(pred.astype(jnp.bfloat16), target.astype(jnp.bfloat16)))
    ref_bf = _reference_dice_loss(pred.astype(jnp.bfloat16), target.astype(jnp.bfloat16))
    assert jnp.allclose(loss_bf, ref_bf, atol=1e-4, rtol=1e-4), (loss_bf, ref_bf)

    # Case 3: squared_pred + jaccard path.
    loss_sq = jax.block_until_ready(dice_loss(pred, target, squared_pred=True, jaccard=True))
    ref_sq = _reference_dice_loss(pred, target, squared_pred=True, jaccard=True)
    assert jnp.allclose(loss_sq, ref_sq, atol=1e-5, rtol=1e-5), (loss_sq, ref_sq)

    # Case 4: HW not a multiple of 128 -> exercises the in-kernel tail mask
    # (no wrapper-side jnp.pad copy).
    B2, N2, H2, W2 = 1, 3, 10, 10
    pred_r = jax.nn.softmax(jax.random.normal(k3, (B2, N2, H2, W2), jnp.float32), axis=1)
    lab_r = jax.random.randint(k4, (B2, 1, H2, W2), 0, N2)
    targ_r = (lab_r == jnp.arange(N2).reshape(1, N2, 1, 1)).astype(jnp.float32)
    loss_r = jax.block_until_ready(dice_loss(pred_r, targ_r))
    ref_r = _reference_dice_loss(pred_r, targ_r)
    assert jnp.allclose(loss_r, ref_r, atol=1e-5, rtol=1e-5), (loss_r, ref_r)

    # Case 5: larger HW.  Forced small blocks exercise the multi-step accumulator
    # + the 2-way parallel HW split; the natural tiling exercises the in-kernel
    # fori_loop over lane groups.
    B3, N3, H3, W3 = 1, 2, 128, 256
    pred_b = jax.nn.softmax(jax.random.normal(k1, (B3, N3, H3, W3), jnp.float32), axis=1)
    lab_b = jax.random.randint(k2, (B3, 1, H3, W3), 0, N3)
    targ_b = (lab_b == jnp.arange(N3).reshape(1, N3, 1, 1)).astype(jnp.float32)
    ref_b = _reference_dice_loss(pred_b, targ_b)
    loss_b = jax.block_until_ready(dice_loss(pred_b, targ_b, max_block_bytes=64 * 1024))
    assert jnp.allclose(loss_b, ref_b, atol=1e-5, rtol=1e-5), (loss_b, ref_b)
    loss_b2 = jax.block_until_ready(dice_loss(pred_b, targ_b))
    assert jnp.allclose(loss_b2, ref_b, atol=1e-5, rtol=1e-5), (loss_b2, ref_b)

    print("KERNEL_OK")
</pallas_src>

<mosaic_0001>
module attributes {stable_mosaic.version = 11 : i64} {
  func.func @_dice_sums_kernel(%arg0: i32, %arg1: i32, %arg2: i32, %arg3: memref<16x128xf32, #tpu.memory_space<vmem>>, %arg4: memref<16x128xf32, #tpu.memory_space<vmem>>, %arg5: memref<1x16x128xf32, #tpu.memory_space<vmem>>, %arg6: memref<1x16x128xf32, #tpu.memory_space<vmem>>, %arg7: memref<1x16x128xf32, #tpu.memory_space<vmem>>) attributes {dimension_semantics = [#tpu.dimension_semantics<parallel>, #tpu.dimension_semantics<parallel>, #tpu.dimension_semantics<arbitrary>], iteration_bounds = array<i64: 1, 1, 1>, scalar_prefetch = 0 : i64, scratch_operands = 0 : i64, tpu.core_type = #tpu.core_type<tc>, window_params = [{transform_indices = @transform_0, window_bounds = array<i64: 16, 128>}, {transform_indices = @transform_1, window_bounds = array<i64: 16, 128>}, {transform_indices = @transform_2, window_bounds = array<i64: 1, 16, 128>}, {transform_indices = @transform_3, window_bounds = array<i64: 1, 16, 128>}, {transform_indices = @transform_4, window_bounds = array<i64: 1, 16, 128>}]} {
    %c0_i32 = arith.constant 0 : i32
    %0 = arith.cmpi eq, %arg2, %c0_i32 : i32
    %1 = arith.extui %0 : i1 to i32
    %c0_i32_0 = arith.constant 0 : i32
    %2 = arith.cmpi ne, %1, %c0_i32_0 : i32
    scf.if %2 {
      %cst_22 = arith.constant 0.000000e+00 : f32
      %28 = vector.broadcast %cst_22 : f32 to vector<16x128xf32>
      %c0_23 = arith.constant 0 : index
      %c0_24 = arith.constant 0 : index
      %c0_25 = arith.constant 0 : index
      %29 = vector.load %arg5[%c0_23, %c0_24, %c0_25] : memref<1x16x128xf32, #tpu.memory_space<vmem>>, vector<1x16x128xf32>
      %30 = vector.shape_cast %29 : vector<1x16x128xf32> to vector<16x128xf32>
      %31 = vector.shape_cast %28 : vector<16x128xf32> to vector<1x16x128xf32>
      tpu.vector_store %arg5[%c0_23, %c0_24, %c0_25], %31 {strides = array<i32>} : memref<1x16x128xf32, #tpu.memory_space<vmem>>, vector<1x16x128xf32>,
      %cst_26 = arith.constant 0.000000e+00 : f32
      %32 = vector.broadcast %cst_26 : f32 to vector<16x128xf32>
      %c0_27 = arith.constant 0 : index
      %c0_28 = arith.constant 0 : index
      %c0_29 = arith.constant 0 : index
      %33 = vector.load %arg6[%c0_27, %c0_28, %c0_29] : memref<1x16x128xf32, #tpu.memory_space<vmem>>, vector<1x16x128xf32>
      %34 = vector.shape_cast %33 : vector<1x16x128xf32> to vector<16x128xf32>
      %35 = vector.shape_cast %32 : vector<16x128xf32> to vector<1x16x128xf32>
      tpu.vector_store %arg6[%c0_27, %c0_28, %c0_29], %35 {strides = array<i32>} : memref<1x16x128xf32, #tpu.memory_space<vmem>>, vector<1x16x128xf32>,
      %cst_30 = arith.constant 0.000000e+00 : f32
      %36 = vector.broadcast %cst_30 : f32 to vector<16x128xf32>
      %c0_31 = arith.constant 0 : index
      %c0_32 = arith.constant 0 : index
      %c0_33 = arith.constant 0 : index
      %37 = vector.load %arg7[%c0_31, %c0_32, %c0_33] : memref<1x16x128xf32, #tpu.memory_space<vmem>>, vector<1x16x128xf32>
      %38 = vector.shape_cast %37 : vector<1x16x128xf32> to vector<16x128xf32>
      %39 = vector.shape_cast %36 : vector<16x128xf32> to vector<1x16x128xf32>
      tpu.vector_store %arg7[%c0_31, %c0_32, %c0_33], %39 {strides = array<i32>} : memref<1x16x128xf32, #tpu.memory_space<vmem>>, vector<1x16x128xf32>,
    } else {
    }
    %cst = arith.constant 0.000000e+00 : f32
    %3 = vector.broadcast %cst : f32 to vector<16x128xf32>
    %c0 = arith.constant 0 : index
    %c0_1 = arith.constant 0 : index
    %4 = vector.load %arg3[%c0, %c0_1] : memref<16x128xf32, #tpu.memory_space<vmem>>, vector<16x128xf32>
    %c0_2 = arith.constant 0 : index
    %c0_3 = arith.constant 0 : index
    %5 = vector.load %arg4[%c0_2, %c0_3] : memref<16x128xf32, #tpu.memory_space<vmem>>, vector<16x128xf32>
    %6 = arith.mulf %4, %5 : vector<16x128xf32>
    %7 = arith.addf %3, %6 : vector<16x128xf32>
    %8 = arith.addf %3, %5 : vector<16x128xf32>
    %9 = arith.addf %3, %4 : vector<16x128xf32>
    %c0_4 = arith.constant 0 : index
    %c0_5 = arith.constant 0 : index
    %c0_6 = arith.constant 0 : index
    %10 = vector.load %arg5[%c0_4, %c0_5, %c0_6] : memref<1x16x128xf32, #tpu.memory_space<vmem>>, vector<1x16x128xf32>
    %11 = vector.shape_cast %10 : vector<1x16x128xf32> to vector<16x128xf32>
    %12 = arith.addf %11, %7 : vector<16x128xf32>
    %c0_7 = arith.constant 0 : index
    %c0_8 = arith.constant 0 : index
    %c0_9 = arith.constant 0 : index
    %13 = vector.load %arg5[%c0_7, %c0_8, %c0_9] : memref<1x16x128xf32, #tpu.memory_space<vmem>>, vector<1x16x128xf32>
    %14 = vector.shape_cast %13 : vector<1x16x128xf32> to vector<16x128xf32>
    %15 = vector.shape_cast %12 : vector<16x128xf32> to vector<1x16x128xf32>
    tpu.vector_store %arg5[%c0_7, %c0_8, %c0_9], %15 {strides = array<i32>} : memref<1x16x128xf32, #tpu.memory_space<vmem>>, vector<1x16x128xf32>,
    %c0_10 = arith.constant 0 : index
    %c0_11 = arith.constant 0 : index
    %c0_12 = arith.constant 0 : index
    %16 = vector.load %arg6[%c0_10, %c0_11, %c0_12] : memref<1x16x128xf32, #tpu.memory_space<vmem>>, vector<1x16x128xf32>
    %17 = vector.shape_cast %16 : vector<1x16x128xf32> to vector<16x128xf32>
    %18 = arith.addf %17, %8 : vector<16x128xf32>
    %c0_13 = arith.constant 0 : index
    %c0_14 = arith.constant 0 : index
    %c0_15 = arith.constant 0 : index
    %19 = vector.load %arg6[%c0_13, %c0_14, %c0_15] : memref<1x16x128xf32, #tpu.memory_space<vmem>>, vector<1x16x128xf32>
    %20 = vector.shape_cast %19 : vector<1x16x128xf32> to vector<16x128xf32>
    %21 = vector.shape_cast %18 : vector<16x128xf32> to vector<1x16x128xf32>
    tpu.vector_store %arg6[%c0_13, %c0_14, %c0_15], %21 {strides = array<i32>} : memref<1x16x128xf32, #tpu.memory_space<vmem>>, vector<1x16x128xf32>,
    %c0_16 = arith.constant 0 : index
    %c0_17 = arith.constant 0 : index
    %c0_18 = arith.constant 0 : index
    %22 = vector.load %arg7[%c0_16, %c0_17, %c0_18] : memref<1x16x128xf32, #tpu.memory_space<vmem>>, vector<1x16x128xf32>
    %23 = vector.shape_cast %22 : vector<1x16x128xf32> to vector<16x128xf32>
    %24 = arith.addf %23, %9 : vector<16x128xf32>
    %c0_19 = arith.constant 0 : index
    %c0_20 = arith.constant 0 : index
    %c0_21 = arith.constant 0 : index
    %25 = vector.load %arg7[%c0_19, %c0_20, %c0_21] : memref<1x16x128xf32, #tpu.memory_space<vmem>>, vector<1x16x128xf32>
    %26 = vector.shape_cast %25 : vector<1x16x128xf32> to vector<16x128xf32>
    %27 = vector.shape_cast %24 : vector<16x128xf32> to vector<1x16x128xf32>
    tpu.vector_store %arg7[%c0_19, %c0_20, %c0_21], %27 {strides = array<i32>} : memref<1x16x128xf32, #tpu.memory_space<vmem>>, vector<1x16x128xf32>,
    return
  }
  func.func @transform_0(%arg0: i32, %arg1: i32, %arg2: i32) -> (i32, i32) {
    %c1_i32 = arith.constant 1 : i32
    %0 = arith.muli %arg0, %c1_i32 : i32
    %1 = arith.addi %0, %arg2 : i32
    %c0_i32 = arith.constant 0 : i32
    return %arg1, %1 : i32, i32
  }
  func.func @transform_1(%arg0: i32, %arg1: i32, %arg2: i32) -> (i32, i32) {
    %c1_i32 = arith.constant 1 : i32
    %0 = arith.muli %arg0, %c1_i32 : i32
    %1 = arith.addi %0, %arg2 : i32
    %c0_i32 = arith.constant 0 : i32
    return %arg1, %1 : i32, i32
  }
  func.func @transform_2(%arg0: i32, %arg1: i32, %arg2: i32) -> (i32, i32, i32) {
    %c0_i32 = arith.constant 0 : i32
    %c0_i32_0 = arith.constant 0 : i32
    return %arg0, %arg1, %c0_i32 : i32, i32, i32
  }
  func.func @transform_3(%arg0: i32, %arg1: i32, %arg2: i32) -> (i32, i32, i32) {
    %c0_i32 = arith.constant 0 : i32
    %c0_i32_0 = arith.constant 0 : i32
    return %arg0, %arg1, %c0_i32 : i32, i32, i32
  }
  func.func @transform_4(%arg0: i32, %arg1: i32, %arg2: i32) -> (i32, i32, i32) {
    %c0_i32 = arith.constant 0 : i32
    %c0_i32_0 = arith.constant 0 : i32
    return %arg0, %arg1, %c0_i32 : i32, i32, i32
  }
}

</mosaic_0001>

<bundles_post_ra>
// kernel: tpu_custom_call.1
= control target key start
LH: loop header
LB: loop body
LE: loop exit
PB: predicated region body
PF: predicated region fallthrough
CT: control target
= control target key end

     0   :  { %10 = vsyncpa [#allocation3], 0  ;;  %s388_s0 = inlined_call_operand.hbm [shape: f32[16,128], index: 0, kind: input, shape index: {}]   ;;  %s389_s1 = inlined_call_operand.hbm [shape: f32[16,128], index: 1, kind: input, shape index: {}]   ;;  %s390_s2 = inlined_call_operand.hbm [shape: f32[1,16,128], index: 2, kind: output, shape index: {0}]   ;;  %s391_s3 = inlined_call_operand.hbm [shape: f32[1,16,128], index: 3, kind: output, shape index: {1}]   ;;  %s392_s4 = inlined_call_operand.hbm [shape: f32[1,16,128], index: 4, kind: output, shape index: {2}]  }
   0x1   :  { %11 = vsyncpa [#allocation6], 0 }
   0x2   :  { %12 = vsyncpa [#allocation4], 0 }
   0x3   :  { %13 = vsyncpa [#allocation9], 0  ;;  %s267_s15 = smov [#allocation2]   ;;  %s149_s19 = scalar_lea.hbm %s388_s0, 256 }
   0x4   :  { %s22_s16 = sshll.u32 %s267_s15, 4  ;;  %p150_p0 = scmp.ne.s32.totalorder %s388_s0, %s149_s19  ;;  %s23_s16 = int_to_ptr.vmem [resolvable:$true] %s22_s16 }
   0x5   :  { %p153_p1 = scmp.lt.u32.totalorder %s149_s19, %s388_s0 }
   0x7   :  { %p155_p2 = pnand %p153_p1, %p150_p0 }
   0x9   :  { %158 = shalt.err (!%p155_p2)
}
   0xa   :  { %s159_s24 = scalar_lea.vmem %s23_s16, 256  ;;  %p164_p4 = scmp.lt.s32.totalorder %s23_s16, %s23_s16 }
   0xb   :  { %p160_p3 = scmp.ne.s32.totalorder %s23_s16, %s159_s24  ;;  %p165_p5 = scmp.lt.s32.totalorder %s159_s24, %s159_s24 }
   0xd   :  { %p166_p6 = por %p165_p5, %p164_p4 }
   0xf   :  { %p167_p7 = pnand %p166_p6, %p160_p3 }
  0x11   :  { %170 = shalt.err (!%p167_p7)
}
  0x12   :  { %s268_s25 = smov 128   ;;  %s269_s26 = smov 8  }
  0x13   :  { %28 = dma.hbm_to_vmem [thread:$0]  %s388_s0, 256, %s23_s16, [#allocation3], %s268_s25, %s268_s25, %s269_s26  }
  0x14   :  { %s270_s29 = smov [#allocation5]   ;;  %s171_s7 = scalar_lea.hbm %s389_s1, 256 }
  0x15   :  { %s37_s30 = sshll.u32 %s270_s29, 4  ;;  %p172_p8 = scmp.ne.s32.totalorder %s389_s1, %s171_s7  ;;  %s38_s30 = int_to_ptr.vmem [resolvable:$true] %s37_s30 }
  0x16   :  { %p175_p9 = scmp.lt.u32.totalorder %s171_s7, %s389_s1 }
  0x18   :  { %p177_p10 = pnand %p175_p9, %p172_p8 }
  0x1a   :  { %180 = shalt.err (!%p177_p10)
}
  0x1b   :  { %s181_s12 = scalar_lea.vmem %s38_s30, 256  ;;  %p186_p12 = scmp.lt.s32.totalorder %s38_s30, %s38_s30 }
  0x1c   :  { %p182_p11 = scmp.ne.s32.totalorder %s38_s30, %s181_s12  ;;  %p187_p13 = scmp.lt.s32.totalorder %s181_s12, %s181_s12 }
  0x1e   :  { %p188_p0 = por %p187_p13, %p186_p12 }
  0x20   :  { %p189_p1 = pnand %p188_p0, %p182_p11 }
  0x22   :  { %192 = shalt.err (!%p189_p1)
}
  0x23   :  { %43 = dma.hbm_to_vmem [thread:$0]  %s389_s1, 256, %s38_s30, [#allocation6], %s268_s25, %s268_s25, %s269_s26  }
  0x24   :  { %259 = dma.done.wait [#allocation3], 256  }
  0x25   :  { %260 = vsyncadd [#allocation3], 4294967040 }
  0x26   :  { %261 = dma.done.wait [#allocation6], 256  }
  0x27   :  { %262 = vsyncadd [#allocation6], 4294967040  ;;  %s271_s14 = smov [#allocation8]   ;;  %s272_s16 = smov [#allocation10]   ;;  %v64_v0 = vld [vmem:[#allocation5] sm:$0xff]  ;;  %v65_v1 = vld [vmem:[#allocation5 + $0x8] sm:$0xff] }
  0x28   :  { %s109_s15 = sshll.u32 %s271_s14, 4  ;;  %s121_s17 = sshll.u32 %s272_s16, 4  ;;  %v62_v2 = vld [vmem:[#allocation2] sm:$0xff]  ;;  %v63_v4 = vld [vmem:[#allocation2 + $0x8] sm:$0xff]  ;;  %84 = vst [vmem:[#allocation8] sm:$0xff] %v64_v0  ;;  %85 = vst [vmem:[#allocation8 + $0x8] sm:$0xff] %v65_v1  ;;  %s110_s15 = int_to_ptr.vmem [resolvable:$true] %s109_s15  ;;  %s329_s17 = int_to_ptr.vmem [resolvable:$true] %s121_s17 }
  0x29   :  { %s273_s18 = smov [#allocation7]   ;;  %v66_v3 = vmul.f32 %v64_v0, %v62_v2  ;;  %v67_v5 = vmul.f32 %v65_v1, %v63_v4  ;;  %90 = vst [vmem:[#allocation10] sm:$0xff] %v62_v2  ;;  %91 = vst [vmem:[#allocation10 + $0x8] sm:$0xff] %v63_v4  ;;  %s193_s1 = scalar_lea.vmem %s110_s15, 256 }
  0x2a   :  { %s97_s19 = sshll.u32 %s273_s18, 4  ;;  %p194_p2 = scmp.ne.s32.totalorder %s110_s15, %s193_s1  ;;  %s331_s19 = int_to_ptr.vmem [resolvable:$true] %s97_s19 }
  0x2b   :  { %p198_p3 = scmp.lt.s32.totalorder %s110_s15, %s110_s15  ;;  %p199_p4 = scmp.lt.s32.totalorder %s193_s1, %s193_s1 }
  0x2d   :  { %p200_p5 = por %p199_p4, %p198_p3 }
  0x2f   :  { %p201_p6 = pnand %p200_p5, %p194_p2 }
  0x31   :  { %204 = shalt.err (!%p201_p6)
}
  0x32   :  { %s205_s22 = scalar_lea.hbm %s391_s3, 256 }
  0x33   :  { %p206_p7 = scmp.ne.s32.totalorder %s391_s3, %s205_s22  ;;  %p209_p8 = scmp.lt.u32.totalorder %s205_s22, %s391_s3 }
  0x35   :  { %p211_p9 = pnand %p209_p8, %p206_p7 }
  0x37   :  { %214 = shalt.err (!%p211_p9)
}
  0x38   :  { %115 = dma.vmem_to_hbm [thread:$0]  %s110_s15, 256, %s391_s3, [#allocation9], %s268_s25, %s268_s25, %s269_s26   ;;  %78 = vst [vmem:[#allocation7] sm:$0xff] %v66_v3 }
  0x39   :  { %s215_s5 = scalar_lea.vmem %s329_s17, 256  ;;  %p220_p11 = scmp.lt.s32.totalorder %s329_s17, %s329_s17 }
  0x3a   :  { %p216_p10 = scmp.ne.s32.totalorder %s329_s17, %s215_s5  ;;  %p221_p12 = scmp.lt.s32.totalorder %s215_s5, %s215_s5 }
  0x3c   :  { %p222_p13 = por %p221_p12, %p220_p11 }
  0x3e   :  { %p223_p0 = pnand %p222_p13, %p216_p10 }
  0x40   :  { %226 = shalt.err (!%p223_p0)
}
  0x41   :  { %s227_s8 = scalar_lea.hbm %s392_s4, 256 }
  0x42   :  { %p228_p1 = scmp.ne.s32.totalorder %s392_s4, %s227_s8  ;;  %p231_p2 = scmp.lt.u32.totalorder %s227_s8, %s392_s4 }
  0x44   :  { %p233_p3 = pnand %p231_p2, %p228_p1 }
  0x46   :  { %236 = shalt.err (!%p233_p3)
}
  0x47   :  { %127 = dma.vmem_to_hbm [thread:$0]  %s329_s17, 256, %s392_s4, [#allocation9], %s268_s25, %s268_s25, %s269_s26   ;;  %79 = vst [vmem:[#allocation7 + $0x8] sm:$0xff] %v67_v5 }
  0x48   :  { %s237_s13 = scalar_lea.vmem %s331_s19, 256  ;;  %p242_p5 = scmp.lt.s32.totalorder %s331_s19, %s331_s19 }
  0x49   :  { %p238_p4 = scmp.ne.s32.totalorder %s331_s19, %s237_s13  ;;  %p243_p6 = scmp.lt.s32.totalorder %s237_s13, %s237_s13 }
  0x4b   :  { %p244_p7 = por %p243_p6, %p242_p5 }
  0x4d   :  { %p245_p8 = pnand %p244_p7, %p238_p4 }
  0x4f   :  { %248 = shalt.err (!%p245_p8)
}
  0x50   :  { %s249_s16 = scalar_lea.hbm %s390_s2, 256 }
  0x51   :  { %p250_p9 = scmp.ne.s32.totalorder %s390_s2, %s249_s16  ;;  %p253_p10 = scmp.lt.u32.totalorder %s249_s16, %s390_s2 }
  0x53   :  { %p255_p11 = pnand %p253_p10, %p250_p9 }
  0x55   :  { %258 = shalt.err (!%p255_p11)
}
  0x56   :  { %103 = dma.vmem_to_hbm [thread:$0]  %s331_s19, 256, %s390_s2, [#allocation4], %s268_s25, %s268_s25, %s269_s26  }
  0x57   :  { %263 = dma.done.wait [#allocation4], 256  }
  0x58   :  { %264 = vsyncadd [#allocation4], 4294967040 }
  0x59   :  { %265 = dma.done.wait [#allocation9], 512  }
  0x5a   :  { %266 = vsyncadd [#allocation9], 4294966784 }
  0x5b   :  { %137 = vsyncpa [#allocation3], 1 }
  0x5c   :  { %138 = vsyncpa [#allocation6], 1 }
  0x5d   :  { %139 = vsyncpa [#allocation4], 1 }
  0x5e   :  { %140 = vsyncpa [#allocation9], 1 }

</bundles_post_ra>
